<compile_context>
chip_gen: v7x
topology: tpu7x:2x2x1
jax: 0.10.0
libtpu: 0.0.40
codegen_flags: <defaults>
</compile_context>

<pallas_src>
import functools

import jax
import jax.numpy as jnp
from jax import lax
from jax.experimental import pallas as pl
from jax.experimental.pallas import tpu as pltpu

_LANE = 128
_SUBLANE_BF16 = 16            # bf16 packs 16 rows per (8,128) f32 sublane-tile
_EPS = 1e-5


def _round_up(x, m):
    return (x + m - 1) // m * m


def _feature_pad(n):
    # v6e/v7x MXU is 256x256 -> align to 256 once the true dim reaches 256;
    # below that, 128 lanes (also what v5e's 128x128 MXU wants).
    return _round_up(n, 256) if n >= 256 else _round_up(n, _LANE)


# ----------------------------------------------------------------------------
# Fused kernel: relu(LN(x@W0+b0)) -> [relu(LN(.@Wd+bd))]*(depth-1) -> .@Wout+bout
# ----------------------------------------------------------------------------
def _mlp_fused_kernel(*refs, depth, width):
    if depth > 1:
        (x_ref, w0_ref, wh_ref, wout_ref,
         b_ref, g_ref, beta_ref, bout_ref, o_ref) = refs
    else:
        (x_ref, w0_ref, wout_ref,
         b_ref, g_ref, beta_ref, bout_ref, o_ref) = refs
        wh_ref = None

    inv_w = 1.0 / float(width)

    def norm_act(h, gamma, beta):
        # One-pass LayerNorm.  Padded feature columns of h are exactly 0
        # (weights/bias zero-padded), so the plain sums over the padded width
        # equal the sums over the real `width`.  Zero-padded gamma/beta re-zero
        # the padded columns after the affine + ReLU, keeping the invariant.
        s1 = jnp.sum(h, axis=-1, keepdims=True)
        s2 = jnp.sum(h * h, axis=-1, keepdims=True)
        mean = s1 * inv_w
        var = jnp.maximum(s2 * inv_w - mean * mean, 0.0)
        hn = (h - mean) * lax.rsqrt(var + _EPS)            # f32 stats, EUP rsqrt
        return jnp.maximum(hn * gamma + beta, 0.0)          # ReLU

    # First layer: bf16 activations/weights in, f32 accumulation on the MXU.
    h = jnp.dot(x_ref[...], w0_ref[...], preferred_element_type=jnp.float32) + b_ref[0]
    a = norm_act(h, g_ref[0], beta_ref[0])

    # Hidden layers, unrolled in Python (depth is static).
    for d in range(depth - 1):
        h = jnp.dot(a.astype(jnp.bfloat16), wh_ref[d],
                    preferred_element_type=jnp.float32) + b_ref[d + 1]
        a = norm_act(h, g_ref[d + 1], beta_ref[d + 1])

    # Final projection (width_pad -> out_pad): lane-dense store.
    y = jnp.dot(a.astype(jnp.bfloat16), wout_ref[...],
                preferred_element_type=jnp.float32) + bout_ref[...]
    o_ref[...] = y.astype(o_ref.dtype)


# ----------------------------------------------------------------------------
# Parameters (deterministic, PyTorch-Linear-style uniform init), padded/stacked
# ----------------------------------------------------------------------------
def init_mlp_params(key, depth, width, input_size, output_size):
    in_pad = _feature_pad(input_size)
    w_pad = _feature_pad(width)
    out_pad = _feature_pad(output_size)

    dims = [input_size] + [width] * depth + [output_size]
    ws, bs = [], []
    for i in range(depth + 1):
        fan_in, fan_out = dims[i], dims[i + 1]
        key, kw, kb = jax.random.split(key, 3)
        bound = 1.0 / float(fan_in) ** 0.5
        ws.append(jax.random.uniform(kw, (fan_in, fan_out), jnp.float32, -bound, bound))
        bs.append(jax.random.uniform(kb, (fan_out,), jnp.float32, -bound, bound))

    def pad2(a, r, c):
        return jnp.zeros((r, c), a.dtype).at[:a.shape[0], :a.shape[1]].set(a)

    # TODO(synk): int8 (v5e/v6e) / fp8 (v7x) hidden-weight quantization would halve
    #             resident-weight VMEM for very wide configs; kept bf16 here.
    w0 = pad2(ws[0], in_pad, w_pad).astype(jnp.bfloat16)
    if depth > 1:
        wh = jnp.stack([pad2(ws[1 + d], w_pad, w_pad) for d in range(depth - 1)]
                       ).astype(jnp.bfloat16)
    else:
        wh = None
    wout = pad2(ws[depth], w_pad, out_pad).astype(jnp.bfloat16)

    b_all = jnp.zeros((depth, 1, w_pad), jnp.float32)
    for d in range(depth):
        b_all = b_all.at[d, 0, :width].set(bs[d])
    bout = jnp.zeros((1, out_pad), jnp.float32).at[0, :output_size].set(bs[depth])

    g_all = jnp.zeros((depth, 1, w_pad), jnp.float32).at[:, :, :width].set(1.0)
    beta_all = jnp.zeros((depth, 1, w_pad), jnp.float32)

    return dict(w0=w0, wh=wh, wout=wout, b=b_all, g=g_all, beta=beta_all,
                bout=bout, depth=depth, width=width, input_size=input_size,
                output_size=output_size, in_pad=in_pad, w_pad=w_pad,
                out_pad=out_pad)


# ----------------------------------------------------------------------------
# Forward wrapper (single pallas_call, batch grid, single-buffered resident weights)
# ----------------------------------------------------------------------------
def mlp_forward(x, params):
    depth, width = params["depth"], params["width"]
    input_size, output_size = params["input_size"], params["output_size"]
    in_pad, w_pad, out_pad = params["in_pad"], params["w_pad"], params["out_pad"]

    B = x.shape[0]
    xf = x.reshape(B, -1)                                  # ext.View(input_size)
    assert xf.shape[1] == input_size

    # Batch tile: multiple of the bf16 sublane tile (16); aim for >= 2 grid steps
    # so the "parallel" batch axis can shard across v7x's 2 TensorCores; cap at
    # 256 to amortize per-step overhead without ballooning f32 intermediates.
    btile = min(256, _round_up(max((B + 1) // 2, 1), _SUBLANE_BF16))
    b_padded = _round_up(B, btile)

    # x is shipped to the kernel in bf16 (halves DMA + double-buffered x VMEM).
    # Skip the extra pad pass entirely when shapes already line up.
    if b_padded == B and in_pad == input_size:
        x_in = xf.astype(jnp.bfloat16)
    else:
        x_in = (jnp.zeros((b_padded, in_pad), jnp.bfloat16)
                .at[:B, :input_size].set(xf.astype(jnp.bfloat16)))

    def resident(shape):
        # Constant-index operand: stays in VMEM for the whole grid, one buffer.
        return pl.BlockSpec(shape, lambda i: (0,) * len(shape),
                            pipeline_mode=pl.Buffered(1))

    in_specs = [pl.BlockSpec((btile, in_pad), lambda i: (i, 0))]   # x tile (pipelined)
    args = [x_in]
    in_specs.append(resident((in_pad, w_pad)));              args.append(params["w0"])
    if depth > 1:
        in_specs.append(resident((depth - 1, w_pad, w_pad))); args.append(params["wh"])
    in_specs.append(resident((w_pad, out_pad)));             args.append(params["wout"])
    in_specs.append(resident((depth, 1, w_pad)));            args.append(params["b"])
    in_specs.append(resident((depth, 1, w_pad)));            args.append(params["g"])
    in_specs.append(resident((depth, 1, w_pad)));            args.append(params["beta"])
    in_specs.append(resident((1, out_pad)));                 args.append(params["bout"])

    # Explicit scoped-VMEM budget: resident weights/params + double-buffered x/out
    # tiles + f32 intermediate headroom.  Floor 32 MiB, cap 100 MiB.
    weight_bytes = (in_pad * w_pad + max(depth - 1, 0) * w_pad * w_pad
                    + w_pad * out_pad) * 2
    param_bytes = (3 * depth * w_pad + out_pad) * 4
    x_tile_bytes = 2 * btile * in_pad * 2
    out_tile_bytes = 2 * btile * out_pad * 4
    interm_bytes = 4 * btile * w_pad * 4
    vmem_limit = int(min(100 << 20,
                         max(32 << 20,
                             weight_bytes + param_bytes + x_tile_bytes
                             + out_tile_bytes + interm_bytes + (8 << 20))))
    # TODO(synk): on v7x (64 MiB/TC), if weight_bytes >~ 40 MiB switch to streaming
    #             hidden weights per layer instead of the all-resident plan.

    kernel = functools.partial(_mlp_fused_kernel, depth=depth, width=width)

    out = pl.pallas_call(
        kernel,
        out_shape=jax.ShapeDtypeStruct((b_padded, out_pad), jnp.float32),
        grid_spec=pltpu.PrefetchScalarGridSpec(
            num_scalar_prefetch=0,
            grid=(b_padded // btile,),
            in_specs=in_specs,
            out_specs=pl.BlockSpec((btile, out_pad), lambda i: (i, 0)),
        ),
        compiler_params=pltpu.CompilerParams(
            dimension_semantics=("parallel",),
            vmem_limit_bytes=vmem_limit),
    )(*args)

    return out[:B, :output_size]


# ----------------------------------------------------------------------------
# Pure-JAX reference mirroring the kernel math (bf16 matmul operands, f32 LN)
# ----------------------------------------------------------------------------
def mlp_reference(x, params):
    depth, width = params["depth"], params["width"]
    input_size, output_size = params["input_size"], params["output_size"]

    def norm_act(h, g, beta):
        mean = jnp.mean(h, axis=-1, keepdims=True)
        var = jnp.mean((h - mean) ** 2, axis=-1, keepdims=True)
        return jnp.maximum((h - mean) * lax.rsqrt(var + _EPS) * g + beta, 0.0)

    B = x.shape[0]
    a = x.reshape(B, -1).astype(jnp.float32)
    w0 = params["w0"][:input_size, :width]
    h = jnp.dot(a.astype(jnp.bfloat16), w0, preferred_element_type=jnp.float32)
    h = h + params["b"][0, :, :width]
    a = norm_act(h, params["g"][0, :, :width], params["beta"][0, :, :width])
    for d in range(depth - 1):
        wd = params["wh"][d, :width, :width]
        h = jnp.dot(a.astype(jnp.bfloat16), wd, preferred_element_type=jnp.float32)
        h = h + params["b"][d + 1, :, :width]
        a = norm_act(h, params["g"][d + 1, :, :width], params["beta"][d + 1, :, :width])
    wout = params["wout"][:width, :output_size]
    return (jnp.dot(a.astype(jnp.bfloat16), wout, preferred_element_type=jnp.float32)
            + params["bout"][:, :output_size])


# ----------------------------------------------------------------------------
if __name__ == "__main__":
    # Small shapes consistent with the module: NCHW image flattened by View.
    B, C, H, W = 2, 1, 8, 8                       # input_size = 64
    depth, width, input_size, output_size = 4, 32, C * H * W, 10

    key = jax.random.PRNGKey(0)
    kx, kp = jax.random.split(key)
    x = jax.random.normal(kx, (B, C, H, W), jnp.float32)
    params = init_mlp_params(kp, depth, width, input_size, output_size)

    out = jax.block_until_ready(mlp_forward(x, params))
    ref = jax.block_until_ready(mlp_reference(x, params))

    assert out.shape == (B, output_size)
    assert jnp.all(jnp.isfinite(out))
    assert jnp.allclose(out, ref, atol=5e-2, rtol=5e-2)
    print("KERNEL_OK")
</pallas_src>

<mosaic_0001>
module attributes {stable_mosaic.version = 11 : i64} {
  func.func @_mlp_fused_kernel(%arg0: i32, %arg1: memref<16x128xbf16, #tpu.memory_space<vmem>>, %arg2: memref<128x128xbf16, #tpu.memory_space<vmem>>, %arg3: memref<3x128x128xbf16, #tpu.memory_space<vmem>>, %arg4: memref<128x128xbf16, #tpu.memory_space<vmem>>, %arg5: memref<4x1x128xf32, #tpu.memory_space<vmem>>, %arg6: memref<4x1x128xf32, #tpu.memory_space<vmem>>, %arg7: memref<4x1x128xf32, #tpu.memory_space<vmem>>, %arg8: memref<1x128xf32, #tpu.memory_space<vmem>>, %arg9: memref<16x128xf32, #tpu.memory_space<vmem>>) attributes {dimension_semantics = [#tpu.dimension_semantics<parallel>], iteration_bounds = array<i64: 1>, scalar_prefetch = 0 : i64, scratch_operands = 0 : i64, tpu.core_type = #tpu.core_type<tc>, window_params = [{transform_indices = @transform_0, window_bounds = array<i64: 16, 128>}, {pipeline_mode = #tpu.pipeline_mode<synchronous>, transform_indices = @transform_1, window_bounds = array<i64: 128, 128>}, {pipeline_mode = #tpu.pipeline_mode<synchronous>, transform_indices = @transform_2, window_bounds = array<i64: 3, 128, 128>}, {pipeline_mode = #tpu.pipeline_mode<synchronous>, transform_indices = @transform_3, window_bounds = array<i64: 128, 128>}, {pipeline_mode = #tpu.pipeline_mode<synchronous>, transform_indices = @transform_4, window_bounds = array<i64: 4, 1, 128>}, {pipeline_mode = #tpu.pipeline_mode<synchronous>, transform_indices = @transform_5, window_bounds = array<i64: 4, 1, 128>}, {pipeline_mode = #tpu.pipeline_mode<synchronous>, transform_indices = @transform_6, window_bounds = array<i64: 4, 1, 128>}, {pipeline_mode = #tpu.pipeline_mode<synchronous>, transform_indices = @transform_7, window_bounds = array<i64: 1, 128>}, {transform_indices = @transform_8, window_bounds = array<i64: 16, 128>}]} {
    %c0 = arith.constant 0 : index
    %c0_0 = arith.constant 0 : index
    %0 = vector.load %arg1[%c0, %c0_0] : memref<16x128xbf16, #tpu.memory_space<vmem>>, vector<16x128xbf16>
    %c0_1 = arith.constant 0 : index
    %c0_2 = arith.constant 0 : index
    %1 = vector.load %arg2[%c0_1, %c0_2] : memref<128x128xbf16, #tpu.memory_space<vmem>>, vector<128x128xbf16>
    %cst = arith.constant dense<0.000000e+00> : vector<16x128xf32>
    %2 = tpu.matmul %0, %1, %cst {dimension_numbers = #tpu.dot_dimension_numbers<[1], [0], [0], [1], [0, 0, 1, 1], [], []>} : vector<16x128xbf16>, vector<128x128xbf16>, vector<16x128xf32> -> vector<16x128xf32>
    %c0_3 = arith.constant 0 : index
    %c0_4 = arith.constant 0 : index
    %c0_5 = arith.constant 0 : index
    %3 = vector.load %arg5[%c0_3, %c0_4, %c0_5] : memref<4x1x128xf32, #tpu.memory_space<vmem>>, vector<1x1x128xf32>
    %4 = vector.shape_cast %3 : vector<1x1x128xf32> to vector<1x128xf32>
    %5 = vector.broadcast %4 : vector<1x128xf32> to vector<16x128xf32>
    %6 = arith.addf %2, %5 : vector<16x128xf32>
    %c0_6 = arith.constant 0 : index
    %c0_7 = arith.constant 0 : index
    %c0_8 = arith.constant 0 : index
    %7 = vector.load %arg6[%c0_6, %c0_7, %c0_8] : memref<4x1x128xf32, #tpu.memory_space<vmem>>, vector<1x1x128xf32>
    %8 = vector.shape_cast %7 : vector<1x1x128xf32> to vector<1x128xf32>
    %c0_9 = arith.constant 0 : index
    %c0_10 = arith.constant 0 : index
    %c0_11 = arith.constant 0 : index
    %9 = vector.load %arg7[%c0_9, %c0_10, %c0_11] : memref<4x1x128xf32, #tpu.memory_space<vmem>>, vector<1x1x128xf32>
    %10 = vector.shape_cast %9 : vector<1x1x128xf32> to vector<1x128xf32>
    %cst_12 = arith.constant dense<0.000000e+00> : vector<16xf32>
    %11 = vector.multi_reduction <add>, %6, %cst_12 [1] : vector<16x128xf32> to vector<16xf32>
    %12 = vector.shape_cast %11 : vector<16xf32> to vector<16x1xf32>
    %13 = arith.mulf %6, %6 : vector<16x128xf32>
    %cst_13 = arith.constant dense<0.000000e+00> : vector<16xf32>
    %14 = vector.multi_reduction <add>, %13, %cst_13 [1] : vector<16x128xf32> to vector<16xf32>
    %15 = vector.shape_cast %14 : vector<16xf32> to vector<16x1xf32>
    %cst_14 = arith.constant 3.125000e-02 : f32
    %16 = vector.broadcast %cst_14 : f32 to vector<16x1xf32>
    %17 = arith.mulf %12, %16 : vector<16x1xf32>
    %cst_15 = arith.constant 3.125000e-02 : f32
    %18 = vector.broadcast %cst_15 : f32 to vector<16x1xf32>
    %19 = arith.mulf %15, %18 : vector<16x1xf32>
    %20 = arith.mulf %17, %17 : vector<16x1xf32>
    %21 = arith.subf %19, %20 : vector<16x1xf32>
    %cst_16 = arith.constant 0.000000e+00 : f32
    %22 = vector.broadcast %cst_16 : f32 to vector<16x1xf32>
    %23 = arith.maximumf %21, %22 : vector<16x1xf32>
    %24 = vector.broadcast %17 : vector<16x1xf32> to vector<16x128xf32>
    %25 = arith.subf %6, %24 : vector<16x128xf32>
    %cst_17 = arith.constant 9.99999974E-6 : f32
    %26 = vector.broadcast %cst_17 : f32 to vector<16x1xf32>
    %27 = arith.addf %23, %26 : vector<16x1xf32>
    %28 = math.rsqrt %27 : vector<16x1xf32>
    %29 = vector.broadcast %28 : vector<16x1xf32> to vector<16x128xf32>
    %30 = arith.mulf %25, %29 : vector<16x128xf32>
    %31 = vector.broadcast %8 : vector<1x128xf32> to vector<16x128xf32>
    %32 = arith.mulf %30, %31 : vector<16x128xf32>
    %33 = vector.broadcast %10 : vector<1x128xf32> to vector<16x128xf32>
    %34 = arith.addf %32, %33 : vector<16x128xf32>
    %cst_18 = arith.constant 0.000000e+00 : f32
    %35 = vector.broadcast %cst_18 : f32 to vector<16x128xf32>
    %36 = arith.maximumf %34, %35 : vector<16x128xf32>
    %37 = arith.truncf %36 : vector<16x128xf32> to vector<16x128xbf16>
    %c0_19 = arith.constant 0 : index
    %c0_20 = arith.constant 0 : index
    %c0_21 = arith.constant 0 : index
    %38 = vector.load %arg3[%c0_19, %c0_20, %c0_21] : memref<3x128x128xbf16, #tpu.memory_space<vmem>>, vector<1x128x128xbf16>
    %39 = vector.shape_cast %38 : vector<1x128x128xbf16> to vector<128x128xbf16>
    %cst_22 = arith.constant dense<0.000000e+00> : vector<16x128xf32>
    %40 = tpu.matmul %37, %39, %cst_22 {dimension_numbers = #tpu.dot_dimension_numbers<[1], [0], [0], [1], [0, 0, 1, 1], [], []>} : vector<16x128xbf16>, vector<128x128xbf16>, vector<16x128xf32> -> vector<16x128xf32>
    %c1 = arith.constant 1 : index
    %c0_23 = arith.constant 0 : index
    %c0_24 = arith.constant 0 : index
    %41 = vector.load %arg5[%c1, %c0_23, %c0_24] : memref<4x1x128xf32, #tpu.memory_space<vmem>>, vector<1x1x128xf32>
    %42 = vector.shape_cast %41 : vector<1x1x128xf32> to vector<1x128xf32>
    %43 = vector.broadcast %42 : vector<1x128xf32> to vector<16x128xf32>
    %44 = arith.addf %40, %43 : vector<16x128xf32>
    %c1_25 = arith.constant 1 : index
    %c0_26 = arith.constant 0 : index
    %c0_27 = arith.constant 0 : index
    %45 = vector.load %arg6[%c1_25, %c0_26, %c0_27] : memref<4x1x128xf32, #tpu.memory_space<vmem>>, vector<1x1x128xf32>
    %46 = vector.shape_cast %45 : vector<1x1x128xf32> to vector<1x128xf32>
    %c1_28 = arith.constant 1 : index
    %c0_29 = arith.constant 0 : index
    %c0_30 = arith.constant 0 : index
    %47 = vector.load %arg7[%c1_28, %c0_29, %c0_30] : memref<4x1x128xf32, #tpu.memory_space<vmem>>, vector<1x1x128xf32>
    %48 = vector.shape_cast %47 : vector<1x1x128xf32> to vector<1x128xf32>
    %cst_31 = arith.constant dense<0.000000e+00> : vector<16xf32>
    %49 = vector.multi_reduction <add>, %44, %cst_31 [1] : vector<16x128xf32> to vector<16xf32>
    %50 = vector.shape_cast %49 : vector<16xf32> to vector<16x1xf32>
    %51 = arith.mulf %44, %44 : vector<16x128xf32>
    %cst_32 = arith.constant dense<0.000000e+00> : vector<16xf32>
    %52 = vector.multi_reduction <add>, %51, %cst_32 [1] : vector<16x128xf32> to vector<16xf32>
    %53 = vector.shape_cast %52 : vector<16xf32> to vector<16x1xf32>
    %cst_33 = arith.constant 3.125000e-02 : f32
    %54 = vector.broadcast %cst_33 : f32 to vector<16x1xf32>
    %55 = arith.mulf %50, %54 : vector<16x1xf32>
    %cst_34 = arith.constant 3.125000e-02 : f32
    %56 = vector.broadcast %cst_34 : f32 to vector<16x1xf32>
    %57 = arith.mulf %53, %56 : vector<16x1xf32>
    %58 = arith.mulf %55, %55 : vector<16x1xf32>
    %59 = arith.subf %57, %58 : vector<16x1xf32>
    %cst_35 = arith.constant 0.000000e+00 : f32
    %60 = vector.broadcast %cst_35 : f32 to vector<16x1xf32>
    %61 = arith.maximumf %59, %60 : vector<16x1xf32>
    %62 = vector.broadcast %55 : vector<16x1xf32> to vector<16x128xf32>
    %63 = arith.subf %44, %62 : vector<16x128xf32>
    %cst_36 = arith.constant 9.99999974E-6 : f32
    %64 = vector.broadcast %cst_36 : f32 to vector<16x1xf32>
    %65 = arith.addf %61, %64 : vector<16x1xf32>
    %66 = math.rsqrt %65 : vector<16x1xf32>
    %67 = vector.broadcast %66 : vector<16x1xf32> to vector<16x128xf32>
    %68 = arith.mulf %63, %67 : vector<16x128xf32>
    %69 = vector.broadcast %46 : vector<1x128xf32> to vector<16x128xf32>
    %70 = arith.mulf %68, %69 : vector<16x128xf32>
    %71 = vector.broadcast %48 : vector<1x128xf32> to vector<16x128xf32>
    %72 = arith.addf %70, %71 : vector<16x128xf32>
    %cst_37 = arith.constant 0.000000e+00 : f32
    %73 = vector.broadcast %cst_37 : f32 to vector<16x128xf32>
    %74 = arith.maximumf %72, %73 : vector<16x128xf32>
    %75 = arith.truncf %74 : vector<16x128xf32> to vector<16x128xbf16>
    %c1_38 = arith.constant 1 : index
    %c0_39 = arith.constant 0 : index
    %c0_40 = arith.constant 0 : index
    %76 = vector.load %arg3[%c1_38, %c0_39, %c0_40] : memref<3x128x128xbf16, #tpu.memory_space<vmem>>, vector<1x128x128xbf16>
    %77 = vector.shape_cast %76 : vector<1x128x128xbf16> to vector<128x128xbf16>
    %cst_41 = arith.constant dense<0.000000e+00> : vector<16x128xf32>
    %78 = tpu.matmul %75, %77, %cst_41 {dimension_numbers = #tpu.dot_dimension_numbers<[1], [0], [0], [1], [0, 0, 1, 1], [], []>} : vector<16x128xbf16>, vector<128x128xbf16>, vector<16x128xf32> -> vector<16x128xf32>
    %c2 = arith.constant 2 : index
    %c0_42 = arith.constant 0 : index
    %c0_43 = arith.constant 0 : index
    %79 = vector.load %arg5[%c2, %c0_42, %c0_43] : memref<4x1x128xf32, #tpu.memory_space<vmem>>, vector<1x1x128xf32>
    %80 = vector.shape_cast %79 : vector<1x1x128xf32> to vector<1x128xf32>
    %81 = vector.broadcast %80 : vector<1x128xf32> to vector<16x128xf32>
    %82 = arith.addf %78, %81 : vector<16x128xf32>
    %c2_44 = arith.constant 2 : index
    %c0_45 = arith.constant 0 : index
    %c0_46 = arith.constant 0 : index
    %83 = vector.load %arg6[%c2_44, %c0_45, %c0_46] : memref<4x1x128xf32, #tpu.memory_space<vmem>>, vector<1x1x128xf32>
    %84 = vector.shape_cast %83 : vector<1x1x128xf32> to vector<1x128xf32>
    %c2_47 = arith.constant 2 : index
    %c0_48 = arith.constant 0 : index
    %c0_49 = arith.constant 0 : index
    %85 = vector.load %arg7[%c2_47, %c0_48, %c0_49] : memref<4x1x128xf32, #tpu.memory_space<vmem>>, vector<1x1x128xf32>
    %86 = vector.shape_cast %85 : vector<1x1x128xf32> to vector<1x128xf32>
    %cst_50 = arith.constant dense<0.000000e+00> : vector<16xf32>
    %87 = vector.multi_reduction <add>, %82, %cst_50 [1] : vector<16x128xf32> to vector<16xf32>
    %88 = vector.shape_cast %87 : vector<16xf32> to vector<16x1xf32>
    %89 = arith.mulf %82, %82 : vector<16x128xf32>
    %cst_51 = arith.constant dense<0.000000e+00> : vector<16xf32>
    %90 = vector.multi_reduction <add>, %89, %cst_51 [1] : vector<16x128xf32> to vector<16xf32>
    %91 = vector.shape_cast %90 : vector<16xf32> to vector<16x1xf32>
    %cst_52 = arith.constant 3.125000e-02 : f32
    %92 = vector.broadcast %cst_52 : f32 to vector<16x1xf32>
    %93 = arith.mulf %88, %92 : vector<16x1xf32>
    %cst_53 = arith.constant 3.125000e-02 : f32
    %94 = vector.broadcast %cst_53 : f32 to vector<16x1xf32>
    %95 = arith.mulf %91, %94 : vector<16x1xf32>
    %96 = arith.mulf %93, %93 : vector<16x1xf32>
    %97 = arith.subf %95, %96 : vector<16x1xf32>
    %cst_54 = arith.constant 0.000000e+00 : f32
    %98 = vector.broadcast %cst_54 : f32 to vector<16x1xf32>
    %99 = arith.maximumf %97, %98 : vector<16x1xf32>
    %100 = vector.broadcast %93 : vector<16x1xf32> to vector<16x128xf32>
    %101 = arith.subf %82, %100 : vector<16x128xf32>
    %cst_55 = arith.constant 9.99999974E-6 : f32
    %102 = vector.broadcast %cst_55 : f32 to vector<16x1xf32>
    %103 = arith.addf %99, %102 : vector<16x1xf32>
    %104 = math.rsqrt %103 : vector<16x1xf32>
    %105 = vector.broadcast %104 : vector<16x1xf32> to vector<16x128xf32>
    %106 = arith.mulf %101, %105 : vector<16x128xf32>
    %107 = vector.broadcast %84 : vector<1x128xf32> to vector<16x128xf32>
    %108 = arith.mulf %106, %107 : vector<16x128xf32>
    %109 = vector.broadcast %86 : vector<1x128xf32> to vector<16x128xf32>
    %110 = arith.addf %108, %109 : vector<16x128xf32>
    %cst_56 = arith.constant 0.000000e+00 : f32
    %111 = vector.broadcast %cst_56 : f32 to vector<16x128xf32>
    %112 = arith.maximumf %110, %111 : vector<16x128xf32>
    %113 = arith.truncf %112 : vector<16x128xf32> to vector<16x128xbf16>
    %c2_57 = arith.constant 2 : index
    %c0_58 = arith.constant 0 : index
    %c0_59 = arith.constant 0 : index
    %114 = vector.load %arg3[%c2_57, %c0_58, %c0_59] : memref<3x128x128xbf16, #tpu.memory_space<vmem>>, vector<1x128x128xbf16>
    %115 = vector.shape_cast %114 : vector<1x128x128xbf16> to vector<128x128xbf16>
    %cst_60 = arith.constant dense<0.000000e+00> : vector<16x128xf32>
    %116 = tpu.matmul %113, %115, %cst_60 {dimension_numbers = #tpu.dot_dimension_numbers<[1], [0], [0], [1], [0, 0, 1, 1], [], []>} : vector<16x128xbf16>, vector<128x128xbf16>, vector<16x128xf32> -> vector<16x128xf32>
    %c3 = arith.constant 3 : index
    %c0_61 = arith.constant 0 : index
    %c0_62 = arith.constant 0 : index
    %117 = vector.load %arg5[%c3, %c0_61, %c0_62] : memref<4x1x128xf32, #tpu.memory_space<vmem>>, vector<1x1x128xf32>
    %118 = vector.shape_cast %117 : vector<1x1x128xf32> to vector<1x128xf32>
    %119 = vector.broadcast %118 : vector<1x128xf32> to vector<16x128xf32>
    %120 = arith.addf %116, %119 : vector<16x128xf32>
    %c3_63 = arith.constant 3 : index
    %c0_64 = arith.constant 0 : index
    %c0_65 = arith.constant 0 : index
    %121 = vector.load %arg6[%c3_63, %c0_64, %c0_65] : memref<4x1x128xf32, #tpu.memory_space<vmem>>, vector<1x1x128xf32>
    %122 = vector.shape_cast %121 : vector<1x1x128xf32> to vector<1x128xf32>
    %c3_66 = arith.constant 3 : index
    %c0_67 = arith.constant 0 : index
    %c0_68 = arith.constant 0 : index
    %123 = vector.load %arg7[%c3_66, %c0_67, %c0_68] : memref<4x1x128xf32, #tpu.memory_space<vmem>>, vector<1x1x128xf32>
    %124 = vector.shape_cast %123 : vector<1x1x128xf32> to vector<1x128xf32>
    %cst_69 = arith.constant dense<0.000000e+00> : vector<16xf32>
    %125 = vector.multi_reduction <add>, %120, %cst_69 [1] : vector<16x128xf32> to vector<16xf32>
    %126 = vector.shape_cast %125 : vector<16xf32> to vector<16x1xf32>
    %127 = arith.mulf %120, %120 : vector<16x128xf32>
    %cst_70 = arith.constant dense<0.000000e+00> : vector<16xf32>
    %128 = vector.multi_reduction <add>, %127, %cst_70 [1] : vector<16x128xf32> to vector<16xf32>
    %129 = vector.shape_cast %128 : vector<16xf32> to vector<16x1xf32>
    %cst_71 = arith.constant 3.125000e-02 : f32
    %130 = vector.broadcast %cst_71 : f32 to vector<16x1xf32>
    %131 = arith.mulf %126, %130 : vector<16x1xf32>
    %cst_72 = arith.constant 3.125000e-02 : f32
    %132 = vector.broadcast %cst_72 : f32 to vector<16x1xf32>
    %133 = arith.mulf %129, %132 : vector<16x1xf32>
    %134 = arith.mulf %131, %131 : vector<16x1xf32>
    %135 = arith.subf %133, %134 : vector<16x1xf32>
    %cst_73 = arith.constant 0.000000e+00 : f32
    %136 = vector.broadcast %cst_73 : f32 to vector<16x1xf32>
    %137 = arith.maximumf %135, %136 : vector<16x1xf32>
    %138 = vector.broadcast %131 : vector<16x1xf32> to vector<16x128xf32>
    %139 = arith.subf %120, %138 : vector<16x128xf32>
    %cst_74 = arith.constant 9.99999974E-6 : f32
    %140 = vector.broadcast %cst_74 : f32 to vector<16x1xf32>
    %141 = arith.addf %137, %140 : vector<16x1xf32>
    %142 = math.rsqrt %141 : vector<16x1xf32>
    %143 = vector.broadcast %142 : vector<16x1xf32> to vector<16x128xf32>
    %144 = arith.mulf %139, %143 : vector<16x128xf32>
    %145 = vector.broadcast %122 : vector<1x128xf32> to vector<16x128xf32>
    %146 = arith.mulf %144, %145 : vector<16x128xf32>
    %147 = vector.broadcast %124 : vector<1x128xf32> to vector<16x128xf32>
    %148 = arith.addf %146, %147 : vector<16x128xf32>
    %cst_75 = arith.constant 0.000000e+00 : f32
    %149 = vector.broadcast %cst_75 : f32 to vector<16x128xf32>
    %150 = arith.maximumf %148, %149 : vector<16x128xf32>
    %151 = arith.truncf %150 : vector<16x128xf32> to vector<16x128xbf16>
    %c0_76 = arith.constant 0 : index
    %c0_77 = arith.constant 0 : index
    %152 = vector.load %arg4[%c0_76, %c0_77] : memref<128x128xbf16, #tpu.memory_space<vmem>>, vector<128x128xbf16>
    %cst_78 = arith.constant dense<0.000000e+00> : vector<16x128xf32>
    %153 = tpu.matmul %151, %152, %cst_78 {dimension_numbers = #tpu.dot_dimension_numbers<[1], [0], [0], [1], [0, 0, 1, 1], [], []>} : vector<16x128xbf16>, vector<128x128xbf16>, vector<16x128xf32> -> vector<16x128xf32>
    %c0_79 = arith.constant 0 : index
    %c0_80 = arith.constant 0 : index
    %154 = vector.load %arg8[%c0_79, %c0_80] : memref<1x128xf32, #tpu.memory_space<vmem>>, vector<1x128xf32>
    %155 = vector.broadcast %154 : vector<1x128xf32> to vector<16x128xf32>
    %156 = arith.addf %153, %155 : vector<16x128xf32>
    %c0_81 = arith.constant 0 : index
    %c0_82 = arith.constant 0 : index
    %157 = vector.load %arg9[%c0_81, %c0_82] : memref<16x128xf32, #tpu.memory_space<vmem>>, vector<16x128xf32>
    tpu.vector_store %arg9[%c0_81, %c0_82], %156 {strides = array<i32>} : memref<16x128xf32, #tpu.memory_space<vmem>>, vector<16x128xf32>,
    return
  }
  func.func @transform_0(%arg0: i32) -> (i32, i32) {
    %c0_i32 = arith.constant 0 : i32
    %c0_i32_0 = arith.constant 0 : i32
    return %arg0, %c0_i32 : i32, i32
  }
  func.func @transform_1(%arg0: i32) -> (i32, i32) {
    %c0_i32 = arith.constant 0 : i32
    %c0_i32_0 = arith.constant 0 : i32
    %c0_i32_1 = arith.constant 0 : i32
    return %c0_i32, %c0_i32_0 : i32, i32
  }
  func.func @transform_2(%arg0: i32) -> (i32, i32, i32) {
    %c0_i32 = arith.constant 0 : i32
    %c0_i32_0 = arith.constant 0 : i32
    %c0_i32_1 = arith.constant 0 : i32
    %c0_i32_2 = arith.constant 0 : i32
    return %c0_i32, %c0_i32_0, %c0_i32_1 : i32, i32, i32
  }
  func.func @transform_3(%arg0: i32) -> (i32, i32) {
    %c0_i32 = arith.constant 0 : i32
    %c0_i32_0 = arith.constant 0 : i32
    %c0_i32_1 = arith.constant 0 : i32
    return %c0_i32, %c0_i32_0 : i32, i32
  }
  func.func @transform_4(%arg0: i32) -> (i32, i32, i32) {
    %c0_i32 = arith.constant 0 : i32
    %c0_i32_0 = arith.constant 0 : i32
    %c0_i32_1 = arith.constant 0 : i32
    %c0_i32_2 = arith.constant 0 : i32
    return %c0_i32, %c0_i32_0, %c0_i32_1 : i32, i32, i32
  }
  func.func @transform_5(%arg0: i32) -> (i32, i32, i32) {
    %c0_i32 = arith.constant 0 : i32
    %c0_i32_0 = arith.constant 0 : i32
    %c0_i32_1 = arith.constant 0 : i32
    %c0_i32_2 = arith.constant 0 : i32
    return %c0_i32, %c0_i32_0, %c0_i32_1 : i32, i32, i32
  }
  func.func @transform_6(%arg0: i32) -> (i32, i32, i32) {
    %c0_i32 = arith.constant 0 : i32
    %c0_i32_0 = arith.constant 0 : i32
    %c0_i32_1 = arith.constant 0 : i32
    %c0_i32_2 = arith.constant 0 : i32
    return %c0_i32, %c0_i32_0, %c0_i32_1 : i32, i32, i32
  }
  func.func @transform_7(%arg0: i32) -> (i32, i32) {
    %c0_i32 = arith.constant 0 : i32
    %c0_i32_0 = arith.constant 0 : i32
    %c0_i32_1 = arith.constant 0 : i32
    return %c0_i32, %c0_i32_0 : i32, i32
  }
  func.func @transform_8(%arg0: i32) -> (i32, i32) {
    %c0_i32 = arith.constant 0 : i32
    %c0_i32_0 = arith.constant 0 : i32
    return %arg0, %c0_i32 : i32, i32
  }
}

</mosaic_0001>

<bundles_post_ra>
// kernel: tpu_custom_call.1
= control target key start
LH: loop header
LB: loop body
LE: loop exit
PB: predicated region body
PF: predicated region fallthrough
CT: control target
= control target key end

     0   :  { %13 = vsyncpa [#allocation3], 0  ;;  %s1507_s0 = inlined_call_operand.hbm [shape: bf16[16,128], index: 0, kind: input, shape index: {}]   ;;  %s1508_s1 = inlined_call_operand.hbm [shape: bf16[128,128], index: 1, kind: input, shape index: {}]   ;;  %s1509_s2 = inlined_call_operand.hbm [shape: bf16[3,128,128], index: 2, kind: input, shape index: {}]   ;;  %s1510_s3 = inlined_call_operand.hbm [shape: bf16[128,128], index: 3, kind: input, shape index: {}]   ;;  %s1511_s4 = inlined_call_operand.vmem [shape: f32[4,1,128], index: 4, kind: input, shape index: {}]   ;;  %s1512_s5 = inlined_call_operand.vmem [shape: f32[4,1,128], index: 5, kind: input, shape index: {}]   ;;  %s1513_s6 = inlined_call_operand.vmem [shape: f32[4,1,128], index: 6, kind: input, shape index: {}]   ;;  %s1514_s7 = inlined_call_operand.vmem [shape: f32[1,128], index: 7, kind: input, shape index: {}]   ;;  %s1515_s8 = inlined_call_operand.hbm [shape: f32[16,128], index: 8, kind: output, shape index: {}]  }
   0x1   :  { %14 = vsyncpa [#allocation6], 0 }
   0x2   :  { %15 = vsyncpa [#allocation9], 0 }
   0x3   :  { %16 = vsyncpa [#allocation4], 0  ;;  %s1276_s27 = smov [#allocation5]   ;;  %s1277_s29 = smov [#allocation2]  }
   0x4   :  { %s34_s28 = sshll.u32 %s1276_s27, 4  ;;  %s22_s30 = sshll.u32 %s1277_s29, 4  ;;  %s35_s28 = int_to_ptr.vmem [resolvable:$true] %s34_s28  ;;  %s1332_s30 = int_to_ptr.vmem [resolvable:$true] %s22_s30 }
   0x5   :  { %s1158_s11 = scalar_lea.hbm %s1508_s1, 1024 }
   0x6   :  { %p1159_p0 = scmp.ne.s32.totalorder %s1508_s1, %s1158_s11  ;;  %p1162_p1 = scmp.lt.u32.totalorder %s1158_s11, %s1508_s1 }
   0x8   :  { %p1164_p2 = pnand %p1162_p1, %p1159_p0 }
   0xa   :  { %1167 = shalt.err (!%p1164_p2)
}
   0xb   :  { %s1168_s16 = scalar_lea.vmem %s35_s28, 1024  ;;  %p1173_p4 = scmp.lt.s32.totalorder %s35_s28, %s35_s28 }
   0xc   :  { %p1169_p3 = scmp.ne.s32.totalorder %s35_s28, %s1168_s16  ;;  %p1174_p5 = scmp.lt.s32.totalorder %s1168_s16, %s1168_s16 }
   0xe   :  { %p1175_p6 = por %p1174_p5, %p1173_p4 }
  0x10   :  { %p1176_p7 = pnand %p1175_p6, %p1169_p3 }
  0x12   :  { %1179 = shalt.err (!%p1176_p7)
}
  0x13   :  { %s1278_s17 = smov 64   ;;  %s1279_s18 = smov 4  }
  0x14   :  { %40 = dma.hbm_to_vmem [thread:$0]  %s1508_s1, 1024, %s35_s28, [#allocation6], %s1278_s17, %s1278_s17, %s1279_s18  }
  0x15   :  { %s1180_s23 = scalar_lea.hbm %s1507_s0, 128 }
  0x16   :  { %p1181_p8 = scmp.ne.s32.totalorder %s1507_s0, %s1180_s23  ;;  %p1184_p9 = scmp.lt.u32.totalorder %s1180_s23, %s1507_s0 }
  0x18   :  { %p1186_p10 = pnand %p1184_p9, %p1181_p8 }
  0x1a   :  { %1189 = shalt.err (!%p1186_p10)
}
  0x1b   :  { %s1190_s29 = scalar_lea.vmem %s1332_s30, 128  ;;  %p1195_p12 = scmp.lt.s32.totalorder %s1332_s30, %s1332_s30 }
  0x1c   :  { %p1191_p11 = scmp.ne.s32.totalorder %s1332_s30, %s1190_s29  ;;  %p1196_p13 = scmp.lt.s32.totalorder %s1190_s29, %s1190_s29 }
  0x1e   :  { %p1197_p0 = por %p1196_p13, %p1195_p12 }
  0x20   :  { %p1198_p1 = pnand %p1197_p0, %p1191_p11 }
  0x22   :  { %1201 = shalt.err (!%p1198_p1)
}
  0x23   :  { %28 = dma.hbm_to_vmem [thread:$0]  %s1507_s0, 128, %s1332_s30, [#allocation3], %s1278_s17, %s1278_s17, %s1279_s18  }
  0x24   :  { %s1280_s9 = smov [#allocation7]   ;;  %s1281_s11 = smov [#allocation8]  }
  0x25   :  { %s46_s10 = sshll.u32 %s1280_s9, 4  ;;  %s58_s12 = sshll.u32 %s1281_s11, 4  ;;  %s47_s10 = int_to_ptr.vmem [resolvable:$true] %s46_s10  ;;  %s1369_s12 = int_to_ptr.vmem [resolvable:$true] %s58_s12 }
  0x26   :  { %s1202_s15 = scalar_lea.hbm %s1509_s2, 3072 }
  0x27   :  { %p1203_p2 = scmp.ne.s32.totalorder %s1509_s2, %s1202_s15  ;;  %p1206_p3 = scmp.lt.u32.totalorder %s1202_s15, %s1509_s2 }
  0x29   :  { %p1208_p4 = pnand %p1206_p3, %p1203_p2 }
  0x2b   :  { %1211 = shalt.err (!%p1208_p4)
}
  0x2c   :  { %s1212_s0 = scalar_lea.vmem %s47_s10, 3072  ;;  %p1217_p6 = scmp.lt.s32.totalorder %s47_s10, %s47_s10 }
  0x2d   :  { %p1213_p5 = scmp.ne.s32.totalorder %s47_s10, %s1212_s0  ;;  %p1218_p7 = scmp.lt.s32.totalorder %s1212_s0, %s1212_s0 }
  0x2f   :  { %p1219_p8 = por %p1218_p7, %p1217_p6 }
  0x31   :  { %p1220_p9 = pnand %p1219_p8, %p1213_p5 }
  0x33   :  { %1223 = shalt.err (!%p1220_p9)
}
  0x34   :  { %52 = dma.hbm_to_vmem [thread:$0]  %s1509_s2, 3072, %s47_s10, [#allocation6], %s1278_s17, %s1278_s17, %s1279_s18  }
  0x35   :  { %s1224_s25 = scalar_lea.hbm %s1510_s3, 1024 }
  0x36   :  { %p1225_p10 = scmp.ne.s32.totalorder %s1510_s3, %s1224_s25  ;;  %p1228_p11 = scmp.lt.u32.totalorder %s1224_s25, %s1510_s3 }
  0x38   :  { %p1230_p12 = pnand %p1228_p11, %p1225_p10 }
  0x3a   :  { %1233 = shalt.err (!%p1230_p12)
}
  0x3b   :  { %s1234_s28 = scalar_lea.vmem %s1369_s12, 1024  ;;  %p1239_p0 = scmp.lt.s32.totalorder %s1369_s12, %s1369_s12 }
  0x3c   :  { %p1235_p13 = scmp.ne.s32.totalorder %s1369_s12, %s1234_s28  ;;  %p1240_p1 = scmp.lt.s32.totalorder %s1234_s28, %s1234_s28 }
  0x3e   :  { %p1241_p2 = por %p1240_p1, %p1239_p0 }
  0x40   :  { %p1242_p3 = pnand %p1241_p2, %p1235_p13 }
  0x42   :  { %1245 = shalt.err (!%p1242_p3)
}
  0x43   :  { %64 = dma.hbm_to_vmem [thread:$0]  %s1510_s3, 1024, %s1369_s12, [#allocation9], %s1278_s17, %s1278_s17, %s1279_s18  }
  0x44   :  { %1268 = dma.done.wait [#allocation3], 128  }
  0x45   :  { %1269 = vsyncadd [#allocation3], 4294967168 }
  0x46   :  { %1270 = dma.done.wait [#allocation6], 4096  }
  0x47   :  { %1271 = vsyncadd [#allocation6], 4294963200 }
  0x48   :  { %1272 = dma.done.wait [#allocation9], 1024  }
  0x49   :  { %1273 = vsyncadd [#allocation9], 4294966272  ;;  %v1282_v0 = vmov 0.0   ;;  %vm1283_vm0 = vmmov 0   ;;  %v1101_v1 = vld [vmem:[#allocation5] sm:$0xff]   ;;  %v1102_v2 = vld [vmem:[#allocation5 + $0x8] sm:$0xff]  }
  0x4a   :  { %990 = vmatprep.subr.bf16.mxu0 %v1282_v0  ;;  %1006 = vmatprep.mubr.msk.bf16.mxu0 %vm1283_vm0, %v1282_v0  ;;  %v1103_v3 = vld [vmem:[#allocation5 + $0x10] sm:$0xff]   ;;  %v1104_v4 = vld [vmem:[#allocation5 + $0x18] sm:$0xff]   ;;  %v1105_v5 = vld [vmem:[#allocation5 + $0x20] sm:$0xff]  }
  0x4b   :  { %1010 = vmatprep.subr.bf16.mxu1 %v1282_v0  ;;  %1026 = vmatprep.mubr.msk.bf16.mxu1 %vm1283_vm0, %v1282_v0  ;;  %v1106_v6 = vld [vmem:[#allocation5 + $0x28] sm:$0xff]   ;;  %v1107_v7 = vld [vmem:[#allocation5 + $0x30] sm:$0xff]   ;;  %v1108_v8 = vld [vmem:[#allocation5 + $0x38] sm:$0xff]  }
  0x4c   :  { %991 = vmatpush3.bf16.msra.mxu0 %v1101_v1  ;;  %v1109_v9 = vld [vmem:[#allocation2] sm:$0xff]   ;;  %v1110_v19 = vld [vmem:[#allocation7] sm:$0xff]   ;;  %v1111_v20 = vld [vmem:[#allocation7 + $0x8] sm:$0xff]  }
  0x4d   :  { %992 = vmatprep.subr.bf16.mxu0 %v1282_v0  ;;  %v882_v10 = vld [vmem:[%s1511_s4] ss:$0 sm:$0xff]  ;;  %1011 = vmatpush3.bf16.msra.mxu1 %v1110_v19  ;;  %v1112_v21 = vld [vmem:[#allocation7 + $0x10] sm:$0xff]   ;;  %v1114_v23 = vld [vmem:[#allocation7 + $0x20] sm:$0xff]  }
  0x4e   :  { %1012 = vmatprep.subr.bf16.mxu1 %v1282_v0  ;;  %v1113_v22 = vld [vmem:[#allocation7 + $0x18] sm:$0xff]   ;;  %v1115_v24 = vld [vmem:[#allocation7 + $0x28] sm:$0xff]   ;;  %v1116_v25 = vld [vmem:[#allocation7 + $0x30] sm:$0xff]  }
  0x4f   :  { %v1117_v26 = vld [vmem:[#allocation7 + $0x38] sm:$0xff]  }
  0x50   :  { %993 = vmatpush3.bf16.msra.mxu0 %v1102_v2  ;;  %v892_v45 = vld [vmem:[%s1512_s5] ss:$0 sm:$0xff]  ;;  %v895_v58 = vld [vmem:[%s1511_s4 + $0x1] ss:$0 sm:$0xff] }
  0x51   :  { %994 = vmatprep.subr.bf16.mxu0 %v1282_v0  ;;  %1013 = vmatpush3.bf16.msra.mxu1 %v1111_v20  ;;  %v893_v50 = vld [vmem:[%s1513_s6] ss:$0 sm:$0xff] }
  0x52   :  { %1014 = vmatprep.subr.bf16.mxu1 %v1282_v0 }
  0x54   :  { %995 = vmatpush3.bf16.msra.mxu0 %v1103_v3 }
  0x55   :  { %996 = vmatprep.subr.bf16.mxu0 %v1282_v0  ;;  %1015 = vmatpush3.bf16.msra.mxu1 %v1112_v21 }
  0x56   :  { %1016 = vmatprep.subr.bf16.mxu1 %v1282_v0 }
  0x58   :  { %997 = vmatpush3.bf16.msra.mxu0 %v1104_v4  ;;  %v1118_v4 = vld [vmem:[#allocation7 + $0x40] sm:$0xff]  }
  0x59   :  { %998 = vmatprep.subr.bf16.mxu0 %v1282_v0  ;;  %1017 = vmatpush3.bf16.msra.mxu1 %v1113_v22 }
  0x5a   :  { %1018 = vmatprep.subr.bf16.mxu1 %v1282_v0 }
  0x5c   :  { %999 = vmatpush3.bf16.msra.mxu0 %v1105_v5  ;;  %v1119_v5 = vld [vmem:[#allocation7 + $0x48] sm:$0xff]  }
  0x5d   :  { %1000 = vmatprep.subr.bf16.mxu0 %v1282_v0  ;;  %1019 = vmatpush3.bf16.msra.mxu1 %v1114_v23 }
  0x5e   :  { %1020 = vmatprep.subr.bf16.mxu1 %v1282_v0 }
  0x60   :  { %1001 = vmatpush3.bf16.msra.mxu0 %v1106_v6  ;;  %v1120_v6 = vld [vmem:[#allocation7 + $0x50] sm:$0xff]  }
  0x61   :  { %1002 = vmatprep.subr.bf16.mxu0 %v1282_v0  ;;  %1021 = vmatpush3.bf16.msra.mxu1 %v1115_v24 }
  0x62   :  { %1022 = vmatprep.subr.bf16.mxu1 %v1282_v0 }
  0x64   :  { %1003 = vmatpush3.bf16.msra.mxu0 %v1107_v7  ;;  %v1121_v7 = vld [vmem:[#allocation7 + $0x58] sm:$0xff]  }
  0x65   :  { %1004 = vmatprep.subr.bf16.mxu0 %v1282_v0  ;;  %1023 = vmatpush3.bf16.msra.mxu1 %v1116_v25 }
  0x66   :  { %1024 = vmatprep.subr.bf16.mxu1 %v1282_v0 }
  0x68   :  { %1005 = vmatpush3.bf16.msra.mxu0 %v1108_v8  ;;  %v1122_v8 = vld [vmem:[#allocation7 + $0x60] sm:$0xff]  }
  0x69   :  { %1030 = vmatprep.subr.bf16.mxu0 %v1282_v0  ;;  %1025 = vmatpush3.bf16.msra.mxu1 %v1117_v26 }
  0x6a   :  { %1050 = vmatprep.subr.bf16.mxu1 %v1282_v0 }
  0x6b   :  { %1007 = vmatmul.mubr.bf16.vlgmr.msra.gmra.mrb[0].mxu0 %v1109_v9  ;;  %v1123_v9 = vld [vmem:[#allocation7 + $0x68] sm:$0xff]  }
  0x6c   :  { %1046 = vmatprep.mubr.msk.bf16.mxu0 %vm1283_vm0, %v1282_v0  ;;  %1031 = vmatpush3.bf16.msra.mxu0 %v1118_v4 }
  0x6d   :  { %1032 = vmatprep.subr.bf16.mxu0 %v1282_v0 }
  0x70   :  { %1033 = vmatpush3.bf16.msra.mxu0 %v1119_v5 }
  0x71   :  { %1034 = vmatprep.subr.bf16.mxu0 %v1282_v0 }
  0x74   :  { %1035 = vmatpush3.bf16.msra.mxu0 %v1120_v6 }
  0x75   :  { %1036 = vmatprep.subr.bf16.mxu0 %v1282_v0 }
  0x78   :  { %1037 = vmatpush3.bf16.msra.mxu0 %v1121_v7 }
  0x79   :  { %1038 = vmatprep.subr.bf16.mxu0 %v1282_v0 }
  0x7c   :  { %1039 = vmatpush3.bf16.msra.mxu0 %v1122_v8 }
  0x7d   :  { %1040 = vmatprep.subr.bf16.mxu0 %v1282_v0 }
  0x80   :  { %1041 = vmatpush3.bf16.msra.mxu0 %v1123_v9 }
  0x81   :  { %1042 = vmatprep.subr.bf16.mxu0 %v1282_v0 }
 0x13e   :  { %v199_v11 = vpop.f32.mrb[0].mxu0 }
 0x13f   :  { %v200_v12 = vadd.f32 %v882_v10, %v199_v11  ;;  %v1008_v13 = vpop.f32.mrb[1].mxu0  ;;  %v1125_v11 = vld [vmem:[#allocation7 + $0x78] sm:$0xff]  }
 0x140   :  { %v202_v14 = vpop.f32.mrb[2].mxu0 }
 0x141   :  { %v203_v15 = vadd.f32 %v882_v10, %v202_v14  ;;  %208 = vadd.xlane.f32.xlu0 %v200_v12  ;;  %v1009_v16 = vpop.f32.mrb[3].mxu0  ;;  %v212_v17 = vmul.f32 %v200_v12, %v200_v12  ;;  %v1124_v10 = vld [vmem:[#allocation7 + $0x70] sm:$0xff]  }
 0x142   :  { %1043 = vmatpush3.bf16.msra.mxu0 %v1124_v10 }
 0x143   :  { %214 = vadd.xlane.f32.xlu1 %v212_v17  ;;  %v213_v18 = vmul.f32 %v203_v15, %v203_v15  ;;  %1044 = vmatprep.subr.bf16.mxu0 %v1282_v0 }
 0x145   :  { %210 = vadd.xlane.f32.xlu0 %v203_v15 }
 0x146   :  { %1045 = vmatpush3.bf16.msra.mxu0 %v1125_v11 }
 0x147   :  { %216 = vadd.xlane.f32.xlu1 %v213_v18  ;;  %1070 = vmatprep.subr.bf16.mxu0 %v1282_v0 }
 0x1ce   :  { %v209_v27 = vpop.xlane.xlu0 %208 }
 0x1cf   :  { %v218_v28 = vmul.f32 0.03125, %v209_v27 }
 0x1d0   :  { %v215_v29 = vpop.xlane.xlu1 %214 }
 0x1d1   :  { %v222_v30 = vmul.f32 %v218_v28, %v218_v28  ;;  %v220_v31 = vmul.f32 0.03125, %v215_v29  ;;  %v228_v43 = vsub.f32 %v200_v12, %v218_v28 }
 0x1d2   :  { %v211_v32 = vpop.xlane.xlu0 %210 }
 0x1d3   :  { %v224_v33 = vsub.f32 %v220_v31, %v222_v30  ;;  %v219_v34 = vmul.f32 0.03125, %v211_v32  ;;  %v906_v30 = vld [vmem:[%s1512_s5 + $0x1] ss:$0 sm:$0xff] }
 0x1d4   :  { %v217_v35 = vpop.xlane.xlu1 %216 }
 0x1d5   :  { %v226_v36 = vmax.f32 %v224_v33, 0.0  ;;  %v223_v37 = vmul.f32 %v219_v34, %v219_v34  ;;  %v221_v38 = vmul.f32 0.03125, %v217_v35  ;;  %v229_v47 = vsub.f32 %v203_v15, %v219_v34  ;;  %v907_v34 = vld [vmem:[%s1513_s6 + $0x1] ss:$0 sm:$0xff] }
 0x1d7   :  { %v230_v39 = vadd.f32 1e-05, %v226_v36  ;;  %v225_v40 = vsub.f32 %v221_v38, %v223_v37 }
 0x1d9   :  { %1142 = vrsqrt.f32 %v230_v39  ;;  %v227_v41 = vmax.f32 %v225_v40, 0.0 }
 0x1db   :  { %v231_v42 = vadd.f32 1e-05, %v227_v41 }
 0x1dd   :  { %1144 = vrsqrt.f32 %v231_v42 }
 0x1e3   :  { %v1143_v44 = vpop.eup %1142 }
 0x1e4   :  { %v234_v46 = vmul.f32 %v1143_v44, %v228_v43  ;;  %v909_v43 = vld [vmem:[%s1511_s4 + $0x2] ss:$0 sm:$0xff] }
 0x1e6   :  { %v242_v48 = vmul.f32 %v892_v45, %v234_v46 }
 0x1e7   :  { %v1145_v49 = vpop.eup %1144 }
 0x1e8   :  { %v235_v51 = vmul.f32 %v1145_v49, %v229_v47  ;;  %v250_v53 = vadd.f32 %v893_v50, %v242_v48 }
 0x1ea   :  { %v243_v52 = vmul.f32 %v892_v45, %v235_v51  ;;  %v252_v55 = vmax.f32 %v250_v53, 0.0  ;;  %v1127_v53 = vld [vmem:[#allocation7 + $0x88] sm:$0xff]  }
 0x1ec   :  { %v251_v54 = vadd.f32 %v893_v50, %v243_v52  ;;  %v1126_v52 = vld [vmem:[#allocation7 + $0x80] sm:$0xff]  }
 0x1ee   :  { %v253_v56 = vmax.f32 %v251_v54, 0.0  ;;  %v1128_v54 = vld [vmem:[#allocation7 + $0x90] sm:$0xff]  }
 0x1f0   :  { %v254_v57 = vpack.c.bf16 %v253_v56, %v252_v55  ;;  %v1129_v55 = vld [vmem:[#allocation7 + $0x98] sm:$0xff]   ;;  %v1130_v56 = vld [vmem:[#allocation7 + $0xa0] sm:$0xff]  }
 0x1f2   :  { %1027 = vmatmul.mubr.bf16.vlgmr.msra.gmra.mrb[0].mxu1 %v254_v57  ;;  %v1131_v57 = vld [vmem:[#allocation7 + $0xa8] sm:$0xff]  }
 0x1f3   :  { %1066 = vmatprep.mubr.msk.bf16.mxu1 %vm1283_vm0, %v1282_v0  ;;  %1051 = vmatpush3.bf16.msra.mxu1 %v1126_v52 }
 0x1f4   :  { %1052 = vmatprep.subr.bf16.mxu1 %v1282_v0 }
 0x1f7   :  { %1053 = vmatpush3.bf16.msra.mxu1 %v1127_v53 }
 0x1f8   :  { %1054 = vmatprep.subr.bf16.mxu1 %v1282_v0 }
 0x1fb   :  { %1055 = vmatpush3.bf16.msra.mxu1 %v1128_v54 }
 0x1fc   :  { %1056 = vmatprep.subr.bf16.mxu1 %v1282_v0 }
 0x1ff   :  { %1057 = vmatpush3.bf16.msra.mxu1 %v1129_v55 }
 0x200   :  { %1058 = vmatprep.subr.bf16.mxu1 %v1282_v0 }
 0x203   :  { %1059 = vmatpush3.bf16.msra.mxu1 %v1130_v56 }
 0x204   :  { %1060 = vmatprep.subr.bf16.mxu1 %v1282_v0 }
 0x207   :  { %1061 = vmatpush3.bf16.msra.mxu1 %v1131_v57 }
 0x208   :  { %1062 = vmatprep.subr.bf16.mxu1 %v1282_v0 }
 0x2c5   :  { %v361_v59 = vpop.f32.mrb[0].mxu1 }
 0x2c6   :  { %v362_v60 = vadd.f32 %v895_v58, %v361_v59  ;;  %v1028_v61 = vpop.f32.mrb[1].mxu1  ;;  %v1133_v59 = vld [vmem:[#allocation7 + $0xb8] sm:$0xff]  }
 0x2c7   :  { %v364_v62 = vpop.f32.mrb[2].mxu1 }
 0x2c8   :  { %v365_v63 = vadd.f32 %v895_v58, %v364_v62  ;;  %372 = vadd.xlane.f32.xlu0 %v362_v60  ;;  %v1029_v1 = vpop.f32.mrb[3].mxu1  ;;  %v376_v2 = vmul.f32 %v362_v60, %v362_v60  ;;  %v1132_v58 = vld [vmem:[#allocation7 + $0xb0] sm:$0xff]  }
 0x2c9   :  { %1063 = vmatpush3.bf16.msra.mxu1 %v1132_v58 }
 0x2ca   :  { %374 = vadd.xlane.f32.xlu1 %v365_v63  ;;  %v377_v3 = vmul.f32 %v365_v63, %v365_v63  ;;  %1064 = vmatprep.subr.bf16.mxu1 %v1282_v0 }
 0x2cc   :  { %378 = vadd.xlane.f32.xlu0 %v376_v2 }
 0x2cd   :  { %1065 = vmatpush3.bf16.msra.mxu1 %v1133_v59 }
 0x2ce   :  { %380 = vadd.xlane.f32.xlu1 %v377_v3 }
 0x355   :  { %v373_v12 = vpop.xlane.xlu0 %372 }
 0x356   :  { %v382_v13 = vmul.f32 0.03125, %v373_v12 }
 0x357   :  { %v375_v14 = vpop.xlane.xlu1 %374 }
 0x358   :  { %v383_v15 = vmul.f32 0.03125, %v375_v14  ;;  %v386_v17 = vmul.f32 %v382_v13, %v382_v13  ;;  %v392_v28 = vsub.f32 %v362_v60, %v382_v13 }
 0x359   :  { %v379_v16 = vpop.xlane.xlu0 %378 }
 0x35a   :  { %v384_v18 = vmul.f32 0.03125, %v379_v16  ;;  %v387_v20 = vmul.f32 %v383_v15, %v383_v15  ;;  %v393_v31 = vsub.f32 %v365_v63, %v383_v15  ;;  %v920_v15 = vld [vmem:[%s1512_s5 + $0x2] ss:$0 sm:$0xff] }
 0x35b   :  { %v381_v19 = vpop.xlane.xlu1 %380 }
 0x35c   :  { %v388_v21 = vsub.f32 %v384_v18, %v386_v17  ;;  %v385_v22 = vmul.f32 0.03125, %v381_v19  ;;  %v921_v19 = vld [vmem:[%s1513_s6 + $0x2] ss:$0 sm:$0xff] }
 0x35e   :  { %v390_v23 = vmax.f32 %v388_v21, 0.0  ;;  %v389_v24 = vsub.f32 %v385_v22, %v387_v20 }
 0x360   :  { %v394_v25 = vadd.f32 1e-05, %v390_v23  ;;  %v391_v26 = vmax.f32 %v389_v24, 0.0 }
 0x362   :  { %1146 = vrsqrt.f32 %v394_v25  ;;  %v395_v27 = vadd.f32 1e-05, %v391_v26 }
 0x364   :  { %1148 = vrsqrt.f32 %v395_v27 }
 0x36c   :  { %v1147_v29 = vpop.eup %1146 }
 0x36d   :  { %v398_v32 = vmul.f32 %v1147_v29, %v392_v28  ;;  %v923_v28 = vld [vmem:[%s1511_s4 + $0x3] ss:$0 sm:$0xff] }
 0x36e   :  { %v1149_v33 = vpop.eup %1148 }
 0x36f   :  { %v399_v35 = vmul.f32 %v1149_v33, %v393_v31  ;;  %v406_v36 = vmul.f32 %v906_v30, %v398_v32 }
 0x371   :  { %v407_v37 = vmul.f32 %v906_v30, %v399_v35  ;;  %v414_v38 = vadd.f32 %v907_v34, %v406_v36 }
 0x373   :  { %v415_v39 = vadd.f32 %v907_v34, %v407_v37  ;;  %v416_v40 = vmax.f32 %v414_v38, 0.0  ;;  %v1134_v37 = vld [vmem:[#allocation8] sm:$0xff]   ;;  %v1135_v38 = vld [vmem:[#allocation8 + $0x8] sm:$0xff]  }
 0x375   :  { %v417_v41 = vmax.f32 %v415_v39, 0.0  ;;  %v1136_v39 = vld [vmem:[#allocation8 + $0x10] sm:$0xff]  }
 0x377   :  { %v418_v42 = vpack.c.bf16 %v417_v41, %v416_v40  ;;  %v1137_v40 = vld [vmem:[#allocation8 + $0x18] sm:$0xff]   ;;  %v1138_v41 = vld [vmem:[#allocation8 + $0x20] sm:$0xff]  }
 0x379   :  { %1047 = vmatmul.mubr.bf16.vlgmr.msra.gmra.mrb[4].mxu0 %v418_v42  ;;  %v1139_v42 = vld [vmem:[#allocation8 + $0x28] sm:$0xff]  }
 0x37a   :  { %1086 = vmatprep.mubr.msk.bf16.mxu0 %vm1283_vm0, %v1282_v0  ;;  %1071 = vmatpush3.bf16.msra.mxu0 %v1134_v37 }
 0x37b   :  { %1072 = vmatprep.subr.bf16.mxu0 %v1282_v0 }
 0x37e   :  { %1073 = vmatpush3.bf16.msra.mxu0 %v1135_v38 }
 0x37f   :  { %1074 = vmatprep.subr.bf16.mxu0 %v1282_v0 }
 0x382   :  { %1075 = vmatpush3.bf16.msra.mxu0 %v1136_v39 }
 0x383   :  { %1076 = vmatprep.subr.bf16.mxu0 %v1282_v0 }
 0x386   :  { %1077 = vmatpush3.bf16.msra.mxu0 %v1137_v40 }
 0x387   :  { %1078 = vmatprep.subr.bf16.mxu0 %v1282_v0 }
 0x38a   :  { %1079 = vmatpush3.bf16.msra.mxu0 %v1138_v41 }
 0x38b   :  { %1080 = vmatprep.subr.bf16.mxu0 %v1282_v0 }
 0x38e   :  { %1081 = vmatpush3.bf16.msra.mxu0 %v1139_v42 }
 0x38f   :  { %1082 = vmatprep.subr.bf16.mxu0 %v1282_v0 }
 0x44c   :  { %v526_v44 = vpop.f32.mrb[4].mxu0 }
 0x44d   :  { %v527_v45 = vadd.f32 %v909_v43, %v526_v44  ;;  %v1048_v46 = vpop.f32.mrb[5].mxu0  ;;  %v1141_v44 = vld [vmem:[#allocation8 + $0x38] sm:$0xff]  }
 0x44e   :  { %v529_v47 = vpop.f32.mrb[6].mxu0 }
 0x44f   :  { %v530_v48 = vadd.f32 %v909_v43, %v529_v47  ;;  %537 = vadd.xlane.f32.xlu0 %v527_v45  ;;  %v1049_v49 = vpop.f32.mrb[7].mxu0  ;;  %v541_v50 = vmul.f32 %v527_v45, %v527_v45  ;;  %v1140_v43 = vld [vmem:[#allocation8 + $0x30] sm:$0xff]  }
 0x450   :  { %1083 = vmatpush3.bf16.msra.mxu0 %v1140_v43 }
 0x451   :  { %539 = vadd.xlane.f32.xlu1 %v530_v48  ;;  %v542_v51 = vmul.f32 %v530_v48, %v530_v48  ;;  %1084 = vmatprep.subr.bf16.mxu0 %v1282_v0 }
 0x453   :  { %543 = vadd.xlane.f32.xlu0 %v541_v50 }
 0x454   :  { %1085 = vmatpush3.bf16.msra.mxu0 %v1141_v44 }
 0x455   :  { %545 = vadd.xlane.f32.xlu1 %v542_v51 }
 0x4dc   :  { %v538_v60 = vpop.xlane.xlu0 %537 }
 0x4dd   :  { %v547_v61 = vmul.f32 0.03125, %v538_v60 }
 0x4de   :  { %v540_v62 = vpop.xlane.xlu1 %539 }
 0x4df   :  { %v548_v63 = vmul.f32 0.03125, %v540_v62  ;;  %v551_v2 = vmul.f32 %v547_v61, %v547_v61  ;;  %v557_v13 = vsub.f32 %v527_v45, %v547_v61  ;;  %v934_v62 = vld [vmem:[%s1512_s5 + $0x3] ss:$0 sm:$0xff]  ;;  %s1284_s5 = smov [#allocation10]  }
 0x4e0   :  { %v544_v1 = vpop.xlane.xlu0 %543  ;;  %s868_s9 = sshll.u32 %s1284_s5, 4  ;;  %s869_s9 = int_to_ptr.vmem [resolvable:$true] %s868_s9 }
 0x4e1   :  { %v549_v3 = vmul.f32 0.03125, %v544_v1  ;;  %v552_v5 = vmul.f32 %v548_v63, %v548_v63  ;;  %v558_v16 = vsub.f32 %v530_v48, %v548_v63  ;;  %p1251_p5 = scmp.lt.s32.totalorder %s869_s9, %s869_s9 }
 0x4e2   :  { %v546_v4 = vpop.xlane.xlu1 %545 }
 0x4e3   :  { %v553_v6 = vsub.f32 %v549_v3, %v551_v2  ;;  %v550_v7 = vmul.f32 0.03125, %v546_v4  ;;  %v935_v3 = vld [vmem:[%s1513_s6 + $0x3] ss:$0 sm:$0xff]  ;;  %s1246_s6 = scalar_lea.vmem %s869_s9, 256 }
 0x4e4   :  { %p1247_p4 = scmp.ne.s32.totalorder %s869_s9, %s1246_s6  ;;  %p1252_p6 = scmp.lt.s32.totalorder %s1246_s6, %s1246_s6 }
 0x4e5   :  { %v555_v8 = vmax.f32 %v553_v6, 0.0  ;;  %v554_v9 = vsub.f32 %v550_v7, %v552_v5 }
 0x4e6   :  { %p1253_p7 = por %p1252_p6, %p1251_p5 }
 0x4e7   :  { %v559_v10 = vadd.f32 1e-05, %v555_v8  ;;  %v556_v11 = vmax.f32 %v554_v9, 0.0 }
 0x4e8   :  { %p1254_p8 = pnand %p1253_p7, %p1247_p4 }
 0x4e9   :  { %1150 = vrsqrt.f32 %v559_v10  ;;  %v560_v12 = vadd.f32 1e-05, %v556_v11 }
 0x4eb   :  { %1152 = vrsqrt.f32 %v560_v12  ;;  %v936_v12 = vld [vmem:[%s1514_s7] ss:$0 sm:$0xff] }
 0x4f3   :  { %v1151_v14 = vpop.eup %1150 }
 0x4f4   :  { %v563_v17 = vmul.f32 %v1151_v14, %v557_v13 }
 0x4f5   :  { %v1153_v18 = vpop.eup %1152 }
 0x4f6   :  { %v564_v20 = vmul.f32 %v1153_v18, %v558_v16  ;;  %v571_v21 = vmul.f32 %v920_v15, %v563_v17 }
 0x4f8   :  { %v572_v22 = vmul.f32 %v920_v15, %v564_v20  ;;  %v579_v23 = vadd.f32 %v921_v19, %v571_v21 }
 0x4fa   :  { %v580_v24 = vadd.f32 %v921_v19, %v572_v22  ;;  %v581_v25 = vmax.f32 %v579_v23, 0.0 }
 0x4fc   :  { %v582_v26 = vmax.f32 %v580_v24, 0.0 }
 0x4fe   :  { %v583_v27 = vpack.c.bf16 %v582_v26, %v581_v25 }
 0x500   :  { %1067 = vmatmul.mubr.bf16.vlgmr.msra.gmra.mrb[4].mxu1 %v583_v27 }
 0x5d3   :  { %v691_v29 = vpop.f32.mrb[4].mxu1 }
 0x5d4   :  { %v692_v30 = vadd.f32 %v923_v28, %v691_v29  ;;  %v1068_v31 = vpop.f32.mrb[5].mxu1 }
 0x5d5   :  { %v694_v32 = vpop.f32.mrb[6].mxu1 }
 0x5d6   :  { %v695_v33 = vadd.f32 %v923_v28, %v694_v32  ;;  %702 = vadd.xlane.f32.xlu0 %v692_v30  ;;  %v1069_v34 = vpop.f32.mrb[7].mxu1  ;;  %v706_v35 = vmul.f32 %v692_v30, %v692_v30 }
 0x5d8   :  { %704 = vadd.xlane.f32.xlu1 %v695_v33  ;;  %v707_v36 = vmul.f32 %v695_v33, %v695_v33 }
 0x5da   :  { %708 = vadd.xlane.f32.xlu0 %v706_v35 }
 0x5dc   :  { %710 = vadd.xlane.f32.xlu1 %v707_v36 }
 0x663   :  { %v703_v45 = vpop.xlane.xlu0 %702 }
 0x664   :  { %v712_v46 = vmul.f32 0.03125, %v703_v45 }
 0x665   :  { %v705_v47 = vpop.xlane.xlu1 %704 }
 0x666   :  { %v713_v48 = vmul.f32 0.03125, %v705_v47  ;;  %v716_v50 = vmul.f32 %v712_v46, %v712_v46  ;;  %v722_v0 = vsub.f32 %v692_v30, %v712_v46 }
 0x667   :  { %v709_v49 = vpop.xlane.xlu0 %708 }
 0x668   :  { %v714_v51 = vmul.f32 0.03125, %v709_v49  ;;  %v717_v53 = vmul.f32 %v713_v48, %v713_v48  ;;  %v723_v63 = vsub.f32 %v695_v33, %v713_v48 }
 0x669   :  { %v711_v52 = vpop.xlane.xlu1 %710 }
 0x66a   :  { %v718_v54 = vsub.f32 %v714_v51, %v716_v50  ;;  %v715_v55 = vmul.f32 0.03125, %v711_v52 }
 0x66c   :  { %v720_v56 = vmax.f32 %v718_v54, 0.0  ;;  %v719_v57 = vsub.f32 %v715_v55, %v717_v53 }
 0x66e   :  { %v724_v58 = vadd.f32 1e-05, %v720_v56  ;;  %v721_v59 = vmax.f32 %v719_v57, 0.0 }
 0x670   :  { %1154 = vrsqrt.f32 %v724_v58  ;;  %v725_v60 = vadd.f32 1e-05, %v721_v59 }
 0x672   :  { %1156 = vrsqrt.f32 %v725_v60 }
 0x67a   :  { %v1155_v61 = vpop.eup %1154 }
 0x67b   :  { %v728_v1 = vmul.f32 %v1155_v61, %v722_v0 }
 0x67c   :  { %v1157_v2 = vpop.eup %1156 }
 0x67d   :  { %v729_v4 = vmul.f32 %v1157_v2, %v723_v63  ;;  %v736_v5 = vmul.f32 %v934_v62, %v728_v1 }
 0x67f   :  { %v737_v6 = vmul.f32 %v934_v62, %v729_v4  ;;  %v744_v7 = vadd.f32 %v935_v3, %v736_v5 }
 0x681   :  { %v745_v8 = vadd.f32 %v935_v3, %v737_v6  ;;  %v746_v9 = vmax.f32 %v744_v7, 0.0 }
 0x683   :  { %v747_v10 = vmax.f32 %v745_v8, 0.0 }
 0x685   :  { %v748_v11 = vpack.c.bf16 %v747_v10, %v746_v9 }
 0x687   :  { %1087 = vmatmul.mubr.bf16.vlgmr.msra.gmra.mrb[8].mxu0 %v748_v11 }
 0x75a   :  { %v854_v13 = vpop.f32.mrb[8].mxu0 }
 0x75b   :  { %v855_v14 = vadd.f32 %v936_v12, %v854_v13  ;;  %v1088_v15 = vpop.f32.mrb[9].mxu0 }
 0x75c   :  { %v857_v16 = vpop.f32.mrb[10].mxu0 }
 0x75d   :  { %861 = vst [vmem:[#allocation10] sm:$0xff] %v855_v14  ;;  %v858_v17 = vadd.f32 %v936_v12, %v857_v16  ;;  %v1089_v18 = vpop.f32.mrb[11].mxu0 }
 0x75f   :  { %862 = vst [vmem:[#allocation10 + $0x8] sm:$0xff] %v858_v17 }
 0x760   :  { %1257 = shalt.err (!%p1254_p8)
}
 0x761   :  { %s1258_s17 = scalar_lea.hbm %s1515_s8, 256 }
 0x762   :  { %p1259_p9 = scmp.ne.s32.totalorder %s1515_s8, %s1258_s17  ;;  %p1262_p10 = scmp.lt.u32.totalorder %s1258_s17, %s1515_s8 }
 0x764   :  { %p1264_p11 = pnand %p1262_p10, %p1259_p9 }
 0x766   :  { %1267 = shalt.err (!%p1264_p11)
}
 0x767   :  { %s1285_s13 = smov 128   ;;  %s1286_s14 = smov 8  }
 0x768   :  { %874 = dma.vmem_to_hbm [thread:$0]  %s869_s9, 256, %s1515_s8, [#allocation4], %s1285_s13, %s1285_s13, %s1286_s14  }
 0x769   :  { %1274 = dma.done.wait [#allocation4], 256  }
 0x76a   :  { %1275 = vsyncadd [#allocation4], 4294967040 }
 0x76b   :  { %878 = vsyncpa [#allocation3], 1 }
 0x76c   :  { %879 = vsyncpa [#allocation6], 1 }
 0x76d   :  { %880 = vsyncpa [#allocation9], 1 }
 0x76e   :  { %881 = vsyncpa [#allocation4], 1 }

</bundles_post_ra>
